<compile_context>
chip_gen: v7x
topology: tpu7x:2x2x1
jax: 0.10.0
libtpu: 0.0.40
codegen_flags: <defaults>
</compile_context>

<pallas_src>
import functools

import jax
import jax.numpy as jnp
from jax.experimental import pallas as pl
from jax.experimental.pallas import tpu as pltpu

EPS = 1e-5


def _round_up(x, m):
    return (x + m - 1) // m * m


def prenorm_linear_kernel(x_ref, gamma_ref, beta_ref, w_ref, lb_ref, o_ref, *, d_real):
    # x_ref: (TM, Dp); gamma/beta/lb: (1, Dp) f32; w_ref: (Dp, Dp) bf16 (= W^T, zero-padded).
    x = x_ref[...].astype(jnp.float32)
    d_pad = x.shape[-1]
    inv_d = 1.0 / d_real

    # --- LayerNorm stats over the real feature columns, in f32 ---
    # Padded columns of x are zero, so sum(x) over the padded row equals the real
    # row-sum. `centered` at a padded column equals -mean, so its squared sum picks
    # up (Dp - D) * mean^2, which we remove with a cheap per-row (TM,1) correction
    # instead of a full-tile mask.
    mean = jnp.sum(x, axis=-1, keepdims=True) * inv_d
    centered = x - mean
    sq = jnp.sum(centered * centered, axis=-1, keepdims=True)
    if d_real != d_pad:
        sq = sq - (d_pad - d_real) * (mean * mean)
    var = sq * inv_d

    x_hat = centered * jax.lax.rsqrt(var + EPS)
    # Padded gamma/beta columns are zero -> padded columns of y are exactly zero
    # (and padded rows of W^T are zero anyway).
    y = x_hat * gamma_ref[...] + beta_ref[...]

    # --- fn = Linear(dim, dim): bf16 MXU matmul, f32 accumulation ---
    out = jnp.dot(y.astype(jnp.bfloat16), w_ref[...],
                  preferred_element_type=jnp.float32) + lb_ref[...]
    o_ref[...] = out.astype(o_ref.dtype)


def _pick_tile_rows(rows, d_pad, x_itemsize, want=512, vmem_budget=48 * 1024 * 1024):
    """Largest row tile (multiple of 8, <= want) whose pipeline buffers fit the budget."""
    tm = min(_round_up(want, 8), _round_up(rows, 8))
    # Resident bf16 weight (conservatively counted double-buffered) + small vectors.
    fixed = 2 * d_pad * d_pad * 2 + 8 * d_pad * 4
    while tm > 8:
        tiles = 2 * (tm * d_pad * x_itemsize) * 2   # in + out tiles, double-buffered
        if fixed + tiles <= vmem_budget:
            break
        tm = _round_up(max(tm // 2, 8), 8)
    return tm


def prenorm(x, gamma, beta, w, lin_b, *, tile_rows=512):
    """x: (B, S, D). gamma, beta, lin_b: (D,). w: (D_out, D_in) PyTorch layout."""
    B, S, D = x.shape
    rows = B * S

    # Lane-dense feature dim (multiple of 128) and adaptive row tile (multiple of 8).
    d_pad = _round_up(D, 128)
    tm = _pick_tile_rows(rows, d_pad, x.dtype.itemsize, want=tile_rows)
    rows_pad = _round_up(rows, tm)

    x2 = x.reshape(rows, D)
    if (rows_pad != rows) or (d_pad != D):
        x2 = jnp.pad(x2, ((0, rows_pad - rows), (0, d_pad - D)))

    f32 = jnp.float32
    gamma2 = jnp.pad(gamma.astype(f32), (0, d_pad - D)).reshape(1, d_pad)
    beta2 = jnp.pad(beta.astype(f32), (0, d_pad - D)).reshape(1, d_pad)
    lin_b2 = jnp.pad(lin_b.astype(f32), (0, d_pad - D)).reshape(1, d_pad)
    # W^T (in_features x out_features) in bf16 for the MXU, zero-padded.
    w_t = jnp.pad(w.T.astype(jnp.bfloat16), ((0, d_pad - D), (0, d_pad - D)))

    grid = (rows_pad // tm,)

    # VMEM budget: double-buffered x/out tiles + resident bf16 weight + vectors.
    vmem_bytes = (2 * tm * d_pad * x.dtype.itemsize        # x tiles
                  + 2 * tm * d_pad * x.dtype.itemsize      # out tiles
                  + 2 * d_pad * d_pad * 2                  # bf16 W (double-buffered)
                  + 8 * d_pad * 4)                         # gamma/beta/bias
    vmem_limit = int(min(max(2 * vmem_bytes, 32 * 1024 * 1024), 64 * 1024 * 1024))

    out = pl.pallas_call(
        functools.partial(prenorm_linear_kernel, d_real=D),
        out_shape=jax.ShapeDtypeStruct((rows_pad, d_pad), x.dtype),
        grid_spec=pltpu.PrefetchScalarGridSpec(
            num_scalar_prefetch=0,
            grid=grid,
            in_specs=[
                pl.BlockSpec((tm, d_pad), lambda i: (i, 0)),      # x tile
                pl.BlockSpec((1, d_pad), lambda i: (0, 0)),       # gamma (f32)
                pl.BlockSpec((1, d_pad), lambda i: (0, 0)),       # beta (f32)
                pl.BlockSpec((d_pad, d_pad), lambda i: (0, 0)),   # W^T (bf16, resident)
                pl.BlockSpec((1, d_pad), lambda i: (0, 0)),       # linear bias (f32)
            ],
            out_specs=pl.BlockSpec((tm, d_pad), lambda i: (i, 0)),
        ),
        compiler_params=pltpu.CompilerParams(
            dimension_semantics=("parallel",),
            vmem_limit_bytes=vmem_limit,
        ),
    )(x2, gamma2, beta2, w_t, lin_b2)

    return out[:rows, :D].reshape(B, S, D)


if __name__ == "__main__":
    B, S, D = 2, 8, 32
    key = jax.random.PRNGKey(0)
    kx, kw, kb = jax.random.split(key, 3)

    x = jax.random.normal(kx, (B, S, D), dtype=jnp.float32)

    # Deterministic parameter init (LayerNorm default: gamma=1, beta=0).
    gamma = jnp.ones((D,), dtype=jnp.float32)
    beta = jnp.zeros((D,), dtype=jnp.float32)
    # fn = Linear(dim, dim), PyTorch weight layout (out_features, in_features).
    w = jax.random.normal(kw, (D, D), dtype=jnp.float32) * 0.05
    lin_b = jax.random.normal(kb, (D,), dtype=jnp.float32) * 0.01

    out = prenorm(x, gamma, beta, w, lin_b)
    jax.block_until_ready(out)

    # Reference: PyTorch LayerNorm + Linear semantics in f32.
    mean = jnp.mean(x, axis=-1, keepdims=True)
    var = jnp.mean((x - mean) ** 2, axis=-1, keepdims=True)
    y_ref = ((x - mean) / jnp.sqrt(var + EPS)) * gamma + beta
    ref_f32 = y_ref @ w.T + lin_b
    # Kernel runs the matmul in bf16 (f32 accumulation) -> bf16-level tolerance.
    assert jnp.allclose(out, ref_f32, atol=2e-2, rtol=2e-2), "mismatch vs f32 reference"

    # Tighter check against a reference that mirrors the bf16 matmul boundary.
    ref_bf16 = jnp.dot(y_ref.astype(jnp.bfloat16), w.T.astype(jnp.bfloat16),
                       preferred_element_type=jnp.float32) + lin_b
    assert jnp.allclose(out, ref_bf16, atol=5e-3, rtol=5e-3), "mismatch vs bf16-matched reference"

    print("KERNEL_OK")
</pallas_src>

<mosaic_0001>
module attributes {stable_mosaic.version = 11 : i64} {
  func.func @prenorm_linear_kernel(%arg0: i32, %arg1: memref<16x128xf32, #tpu.memory_space<vmem>>, %arg2: memref<1x128xf32, #tpu.memory_space<vmem>>, %arg3: memref<1x128xf32, #tpu.memory_space<vmem>>, %arg4: memref<128x128xbf16, #tpu.memory_space<vmem>>, %arg5: memref<1x128xf32, #tpu.memory_space<vmem>>, %arg6: memref<16x128xf32, #tpu.memory_space<vmem>>) attributes {dimension_semantics = [#tpu.dimension_semantics<parallel>], iteration_bounds = array<i64: 1>, scalar_prefetch = 0 : i64, scratch_operands = 0 : i64, tpu.core_type = #tpu.core_type<tc>, window_params = [{transform_indices = @transform_0, window_bounds = array<i64: 16, 128>}, {pipeline_mode = #tpu.pipeline_mode<synchronous>, transform_indices = @transform_1, window_bounds = array<i64: 1, 128>}, {pipeline_mode = #tpu.pipeline_mode<synchronous>, transform_indices = @transform_2, window_bounds = array<i64: 1, 128>}, {pipeline_mode = #tpu.pipeline_mode<synchronous>, transform_indices = @transform_3, window_bounds = array<i64: 128, 128>}, {pipeline_mode = #tpu.pipeline_mode<synchronous>, transform_indices = @transform_4, window_bounds = array<i64: 1, 128>}, {transform_indices = @transform_5, window_bounds = array<i64: 16, 128>}]} {
    %c0 = arith.constant 0 : index
    %c0_0 = arith.constant 0 : index
    %0 = vector.load %arg1[%c0, %c0_0] : memref<16x128xf32, #tpu.memory_space<vmem>>, vector<16x128xf32>
    %cst = arith.constant dense<0.000000e+00> : vector<16xf32>
    %1 = vector.multi_reduction <add>, %0, %cst [1] : vector<16x128xf32> to vector<16xf32>
    %2 = vector.shape_cast %1 : vector<16xf32> to vector<16x1xf32>
    %cst_1 = arith.constant 3.125000e-02 : f32
    %3 = vector.broadcast %cst_1 : f32 to vector<16x1xf32>
    %4 = arith.mulf %2, %3 : vector<16x1xf32>
    %5 = vector.broadcast %4 : vector<16x1xf32> to vector<16x128xf32>
    %6 = arith.subf %0, %5 : vector<16x128xf32>
    %7 = arith.mulf %6, %6 : vector<16x128xf32>
    %cst_2 = arith.constant dense<0.000000e+00> : vector<16xf32>
    %8 = vector.multi_reduction <add>, %7, %cst_2 [1] : vector<16x128xf32> to vector<16xf32>
    %9 = vector.shape_cast %8 : vector<16xf32> to vector<16x1xf32>
    %10 = arith.mulf %4, %4 : vector<16x1xf32>
    %cst_3 = arith.constant 9.600000e+01 : f32
    %11 = vector.broadcast %cst_3 : f32 to vector<16x1xf32>
    %12 = arith.mulf %11, %10 : vector<16x1xf32>
    %13 = arith.subf %9, %12 : vector<16x1xf32>
    %cst_4 = arith.constant 3.125000e-02 : f32
    %14 = vector.broadcast %cst_4 : f32 to vector<16x1xf32>
    %15 = arith.mulf %13, %14 : vector<16x1xf32>
    %cst_5 = arith.constant 9.99999974E-6 : f32
    %16 = vector.broadcast %cst_5 : f32 to vector<16x1xf32>
    %17 = arith.addf %15, %16 : vector<16x1xf32>
    %18 = math.rsqrt %17 : vector<16x1xf32>
    %19 = vector.broadcast %18 : vector<16x1xf32> to vector<16x128xf32>
    %20 = arith.mulf %6, %19 : vector<16x128xf32>
    %c0_6 = arith.constant 0 : index
    %c0_7 = arith.constant 0 : index
    %21 = vector.load %arg2[%c0_6, %c0_7] : memref<1x128xf32, #tpu.memory_space<vmem>>, vector<1x128xf32>
    %22 = vector.broadcast %21 : vector<1x128xf32> to vector<16x128xf32>
    %23 = arith.mulf %20, %22 : vector<16x128xf32>
    %c0_8 = arith.constant 0 : index
    %c0_9 = arith.constant 0 : index
    %24 = vector.load %arg3[%c0_8, %c0_9] : memref<1x128xf32, #tpu.memory_space<vmem>>, vector<1x128xf32>
    %25 = vector.broadcast %24 : vector<1x128xf32> to vector<16x128xf32>
    %26 = arith.addf %23, %25 : vector<16x128xf32>
    %27 = arith.truncf %26 : vector<16x128xf32> to vector<16x128xbf16>
    %c0_10 = arith.constant 0 : index
    %c0_11 = arith.constant 0 : index
    %28 = vector.load %arg4[%c0_10, %c0_11] : memref<128x128xbf16, #tpu.memory_space<vmem>>, vector<128x128xbf16>
    %cst_12 = arith.constant dense<0.000000e+00> : vector<16x128xf32>
    %29 = tpu.matmul %27, %28, %cst_12 {dimension_numbers = #tpu.dot_dimension_numbers<[1], [0], [0], [1], [0, 0, 1, 1], [], []>} : vector<16x128xbf16>, vector<128x128xbf16>, vector<16x128xf32> -> vector<16x128xf32>
    %c0_13 = arith.constant 0 : index
    %c0_14 = arith.constant 0 : index
    %30 = vector.load %arg5[%c0_13, %c0_14] : memref<1x128xf32, #tpu.memory_space<vmem>>, vector<1x128xf32>
    %31 = vector.broadcast %30 : vector<1x128xf32> to vector<16x128xf32>
    %32 = arith.addf %29, %31 : vector<16x128xf32>
    %c0_15 = arith.constant 0 : index
    %c0_16 = arith.constant 0 : index
    %33 = vector.load %arg6[%c0_15, %c0_16] : memref<16x128xf32, #tpu.memory_space<vmem>>, vector<16x128xf32>
    tpu.vector_store %arg6[%c0_15, %c0_16], %32 {strides = array<i32>} : memref<16x128xf32, #tpu.memory_space<vmem>>, vector<16x128xf32>,
    return
  }
  func.func @transform_0(%arg0: i32) -> (i32, i32) {
    %c0_i32 = arith.constant 0 : i32
    %c0_i32_0 = arith.constant 0 : i32
    return %arg0, %c0_i32 : i32, i32
  }
  func.func @transform_1(%arg0: i32) -> (i32, i32) {
    %c0_i32 = arith.constant 0 : i32
    %c0_i32_0 = arith.constant 0 : i32
    %c0_i32_1 = arith.constant 0 : i32
    return %c0_i32, %c0_i32_0 : i32, i32
  }
  func.func @transform_2(%arg0: i32) -> (i32, i32) {
    %c0_i32 = arith.constant 0 : i32
    %c0_i32_0 = arith.constant 0 : i32
    %c0_i32_1 = arith.constant 0 : i32
    return %c0_i32, %c0_i32_0 : i32, i32
  }
  func.func @transform_3(%arg0: i32) -> (i32, i32) {
    %c0_i32 = arith.constant 0 : i32
    %c0_i32_0 = arith.constant 0 : i32
    %c0_i32_1 = arith.constant 0 : i32
    return %c0_i32, %c0_i32_0 : i32, i32
  }
  func.func @transform_4(%arg0: i32) -> (i32, i32) {
    %c0_i32 = arith.constant 0 : i32
    %c0_i32_0 = arith.constant 0 : i32
    %c0_i32_1 = arith.constant 0 : i32
    return %c0_i32, %c0_i32_0 : i32, i32
  }
  func.func @transform_5(%arg0: i32) -> (i32, i32) {
    %c0_i32 = arith.constant 0 : i32
    %c0_i32_0 = arith.constant 0 : i32
    return %arg0, %c0_i32 : i32, i32
  }
}

</mosaic_0001>

<bundles_post_ra>
// kernel: tpu_custom_call.1
= control target key start
LH: loop header
LB: loop body
LE: loop exit
PB: predicated region body
PF: predicated region fallthrough
CT: control target
= control target key end

     0   :  { %10 = vsyncpa [#allocation3], 0  ;;  %s454_s0 = inlined_call_operand.hbm [shape: f32[16,128], index: 0, kind: input, shape index: {}]   ;;  %s455_s1 = inlined_call_operand.vmem [shape: f32[1,128], index: 1, kind: input, shape index: {}]   ;;  %s456_s2 = inlined_call_operand.vmem [shape: f32[1,128], index: 2, kind: input, shape index: {}]   ;;  %s457_s3 = inlined_call_operand.hbm [shape: bf16[128,128], index: 3, kind: input, shape index: {}]   ;;  %s458_s4 = inlined_call_operand.vmem [shape: f32[1,128], index: 4, kind: input, shape index: {}]   ;;  %s459_s5 = inlined_call_operand.hbm [shape: f32[16,128], index: 5, kind: output, shape index: {}]  }
   0x1   :  { %11 = vsyncpa [#allocation6], 0 }
   0x2   :  { %12 = vsyncpa [#allocation4], 0  ;;  %s364_s18 = smov [#allocation2]   ;;  %s292_s22 = scalar_lea.hbm %s454_s0, 256 }
   0x3   :  { %s18_s19 = sshll.u32 %s364_s18, 4  ;;  %p293_p0 = scmp.ne.s32.totalorder %s454_s0, %s292_s22  ;;  %s19_s19 = int_to_ptr.vmem [resolvable:$true] %s18_s19 }
   0x4   :  { %p296_p1 = scmp.lt.u32.totalorder %s292_s22, %s454_s0 }
   0x6   :  { %p298_p2 = pnand %p296_p1, %p293_p0 }
   0x8   :  { %301 = shalt.err (!%p298_p2)
}
   0x9   :  { %s302_s27 = scalar_lea.vmem %s19_s19, 256  ;;  %p307_p4 = scmp.lt.s32.totalorder %s19_s19, %s19_s19 }
   0xa   :  { %p303_p3 = scmp.ne.s32.totalorder %s19_s19, %s302_s27  ;;  %p308_p5 = scmp.lt.s32.totalorder %s302_s27, %s302_s27 }
   0xc   :  { %p309_p6 = por %p308_p5, %p307_p4 }
   0xe   :  { %p310_p7 = pnand %p309_p6, %p303_p3 }
  0x10   :  { %313 = shalt.err (!%p310_p7)
}
  0x11   :  { %s365_s28 = smov 128   ;;  %s366_s29 = smov 8  }
  0x12   :  { %24 = dma.hbm_to_vmem [thread:$0]  %s454_s0, 256, %s19_s19, [#allocation3], %s365_s28, %s365_s28, %s366_s29  }
  0x13   :  { %s367_s7 = smov [#allocation5]   ;;  %s314_s11 = scalar_lea.hbm %s457_s3, 1024 }
  0x14   :  { %s34_s8 = sshll.u32 %s367_s7, 4  ;;  %p315_p8 = scmp.ne.s32.totalorder %s457_s3, %s314_s11  ;;  %s35_s8 = int_to_ptr.vmem [resolvable:$true] %s34_s8 }
  0x15   :  { %p318_p9 = scmp.lt.u32.totalorder %s314_s11, %s457_s3 }
  0x17   :  { %p320_p10 = pnand %p318_p9, %p315_p8 }
  0x19   :  { %323 = shalt.err (!%p320_p10)
}
  0x1a   :  { %s324_s16 = scalar_lea.vmem %s35_s8, 1024  ;;  %p329_p12 = scmp.lt.s32.totalorder %s35_s8, %s35_s8 }
  0x1b   :  { %p325_p11 = scmp.ne.s32.totalorder %s35_s8, %s324_s16  ;;  %p330_p13 = scmp.lt.s32.totalorder %s324_s16, %s324_s16 }
  0x1d   :  { %p331_p0 = por %p330_p13, %p329_p12 }
  0x1f   :  { %p332_p1 = pnand %p331_p0, %p325_p11 }
  0x21   :  { %335 = shalt.err (!%p332_p1)
}
  0x22   :  { %s368_s0 = smov 64   ;;  %s369_s17 = smov 4  }
  0x23   :  { %40 = dma.hbm_to_vmem [thread:$0]  %s457_s3, 1024, %s35_s8, [#allocation6], %s368_s0, %s368_s0, %s369_s17  }
  0x24   :  { %358 = dma.done.wait [#allocation3], 256  }
  0x25   :  { %359 = vsyncadd [#allocation3], 4294967040 }
  0x26   :  { %360 = dma.done.wait [#allocation6], 1024  }
  0x27   :  { %361 = vsyncadd [#allocation6], 4294966272  ;;  %v50_v0 = vld [vmem:[#allocation2] sm:$0xff]  ;;  %v51_v1 = vld [vmem:[#allocation2 + $0x8] sm:$0xff]  ;;  %v370_v3 = vmov 0.0   ;;  %vm371_vm0 = vmmov 0  }
  0x28   :  { %52 = vadd.xlane.f32.xlu0 %v50_v0  ;;  %v280_v2 = vld [vmem:[#allocation5] sm:$0xff]   ;;  %251 = vmatprep.subr.bf16.mxu0 %v370_v3  ;;  %v281_v12 = vld [vmem:[#allocation5 + $0x8] sm:$0xff]   ;;  %v282_v13 = vld [vmem:[#allocation5 + $0x10] sm:$0xff]   ;;  %s372_s25 = smov [#allocation7]  }
  0x29   :  { %252 = vmatpush3.bf16.msra.mxu0 %v280_v2  ;;  %v283_v14 = vld [vmem:[#allocation5 + $0x18] sm:$0xff]   ;;  %v284_v15 = vld [vmem:[#allocation5 + $0x20] sm:$0xff]   ;;  %267 = vmatprep.mubr.msk.bf16.mxu0 %vm371_vm0, %v370_v3  ;;  %v285_v16 = vld [vmem:[#allocation5 + $0x28] sm:$0xff]   ;;  %s218_s26 = sshll.u32 %s372_s25, 4  ;;  %s219_s26 = int_to_ptr.vmem [resolvable:$true] %s218_s26 }
  0x2a   :  { %253 = vmatprep.subr.bf16.mxu0 %v370_v3  ;;  %v286_v17 = vld [vmem:[#allocation5 + $0x30] sm:$0xff]   ;;  %v287_v18 = vld [vmem:[#allocation5 + $0x38] sm:$0xff]   ;;  %p341_p3 = scmp.lt.s32.totalorder %s219_s26, %s219_s26 }
  0x2b   :  { %v231_v33 = vld [vmem:[%s455_s1] ss:$0 sm:$0xff]  ;;  %s336_s1 = scalar_lea.vmem %s219_s26, 256 }
  0x2c   :  { %54 = vadd.xlane.f32.xlu0 %v51_v1  ;;  %v232_v37 = vld [vmem:[%s456_s2] ss:$0 sm:$0xff]  ;;  %p337_p2 = scmp.ne.s32.totalorder %s219_s26, %s336_s1  ;;  %p342_p4 = scmp.lt.s32.totalorder %s336_s1, %s336_s1 }
  0x2d   :  { %254 = vmatpush3.bf16.msra.mxu0 %v281_v12  ;;  %v233_v42 = vld [vmem:[%s458_s4] ss:$0 sm:$0xff] }
  0x2e   :  { %255 = vmatprep.subr.bf16.mxu0 %v370_v3  ;;  %p343_p5 = por %p342_p4, %p341_p3 }
  0x30   :  { %p344_p6 = pnand %p343_p5, %p337_p2 }
  0x31   :  { %256 = vmatpush3.bf16.msra.mxu0 %v282_v13 }
  0x32   :  { %257 = vmatprep.subr.bf16.mxu0 %v370_v3 }
  0x35   :  { %258 = vmatpush3.bf16.msra.mxu0 %v283_v14 }
  0x36   :  { %259 = vmatprep.subr.bf16.mxu0 %v370_v3 }
  0x39   :  { %260 = vmatpush3.bf16.msra.mxu0 %v284_v15 }
  0x3a   :  { %261 = vmatprep.subr.bf16.mxu0 %v370_v3 }
  0x3d   :  { %262 = vmatpush3.bf16.msra.mxu0 %v285_v16 }
  0x3e   :  { %263 = vmatprep.subr.bf16.mxu0 %v370_v3 }
  0x41   :  { %264 = vmatpush3.bf16.msra.mxu0 %v286_v17 }
  0x42   :  { %265 = vmatprep.subr.bf16.mxu0 %v370_v3 }
  0x45   :  { %266 = vmatpush3.bf16.msra.mxu0 %v287_v18 }
  0xb5   :  { %v53_v4 = vpop.xlane.xlu0 %52 }
  0xb6   :  { %v56_v5 = vmul.f32 0.03125, %v53_v4 }
  0xb8   :  { %v58_v6 = vsub.f32 %v50_v0, %v56_v5  ;;  %v66_v19 = vmul.f32 %v56_v5, %v56_v5 }
  0xb9   :  { %v55_v7 = vpop.xlane.xlu0 %54 }
  0xba   :  { %v57_v8 = vmul.f32 0.03125, %v55_v7  ;;  %v60_v9 = vmul.f32 %v58_v6, %v58_v6  ;;  %v68_v21 = vmul.f32 96.0, %v66_v19 }
  0xbc   :  { %v59_v10 = vsub.f32 %v51_v1, %v57_v8  ;;  %62 = vadd.xlane.f32.xlu1 %v60_v9  ;;  %v67_v20 = vmul.f32 %v57_v8, %v57_v8 }
  0xbe   :  { %v61_v11 = vmul.f32 %v59_v10, %v59_v10  ;;  %v69_v24 = vmul.f32 96.0, %v67_v20 }
  0xc0   :  { %64 = vadd.xlane.f32.xlu1 %v61_v11 }
 0x149   :  { %v63_v22 = vpop.xlane.xlu1 %62 }
 0x14a   :  { %v70_v23 = vsub.f32 %v63_v22, %v68_v21 }
 0x14c   :  { %v72_v25 = vmul.f32 0.03125, %v70_v23 }
 0x14d   :  { %v65_v26 = vpop.xlane.xlu1 %64 }
 0x14e   :  { %v74_v27 = vadd.f32 1e-05, %v72_v25  ;;  %v71_v28 = vsub.f32 %v65_v26, %v69_v24 }
 0x150   :  { %288 = vrsqrt.f32 %v74_v27  ;;  %v73_v29 = vmul.f32 0.03125, %v71_v28 }
 0x152   :  { %v75_v30 = vadd.f32 1e-05, %v73_v29 }
 0x154   :  { %290 = vrsqrt.f32 %v75_v30 }
 0x15a   :  { %v289_v31 = vpop.eup %288 }
 0x15b   :  { %v78_v32 = vmul.f32 %v289_v31, %v58_v6 }
 0x15d   :  { %v87_v36 = vmul.f32 %v231_v33, %v78_v32 }
 0x15e   :  { %v291_v34 = vpop.eup %290 }
 0x15f   :  { %v79_v35 = vmul.f32 %v291_v34, %v59_v10  ;;  %v96_v39 = vadd.f32 %v232_v37, %v87_v36 }
 0x161   :  { %v88_v38 = vmul.f32 %v231_v33, %v79_v35 }
 0x163   :  { %v97_v40 = vadd.f32 %v232_v37, %v88_v38 }
 0x165   :  { %v98_v41 = vpack.c.bf16 %v97_v40, %v96_v39 }
 0x167   :  { %268 = vmatmul.mubr.bf16.vlgmr.msra.gmra.mrb[0].mxu0 %v98_v41 }
 0x23a   :  { %v204_v43 = vpop.f32.mrb[0].mxu0 }
 0x23b   :  { %v205_v44 = vadd.f32 %v233_v42, %v204_v43  ;;  %v269_v45 = vpop.f32.mrb[1].mxu0 }
 0x23c   :  { %v207_v46 = vpop.f32.mrb[2].mxu0 }
 0x23d   :  { %211 = vst [vmem:[#allocation7] sm:$0xff] %v205_v44  ;;  %v208_v47 = vadd.f32 %v233_v42, %v207_v46  ;;  %v270_v48 = vpop.f32.mrb[3].mxu0 }
 0x23f   :  { %212 = vst [vmem:[#allocation7 + $0x8] sm:$0xff] %v208_v47 }
 0x240   :  { %347 = shalt.err (!%p344_p6)
}
 0x241   :  { %s348_s27 = scalar_lea.hbm %s459_s5, 256 }
 0x242   :  { %p349_p7 = scmp.ne.s32.totalorder %s459_s5, %s348_s27  ;;  %p352_p8 = scmp.lt.u32.totalorder %s348_s27, %s459_s5 }
 0x244   :  { %p354_p9 = pnand %p352_p8, %p349_p7 }
 0x246   :  { %357 = shalt.err (!%p354_p9)
}
 0x247   :  { %224 = dma.vmem_to_hbm [thread:$0]  %s219_s26, 256, %s459_s5, [#allocation4], %s365_s28, %s365_s28, %s366_s29  }
 0x248   :  { %362 = dma.done.wait [#allocation4], 256  }
 0x249   :  { %363 = vsyncadd [#allocation4], 4294967040 }
 0x24a   :  { %228 = vsyncpa [#allocation3], 1 }
 0x24b   :  { %229 = vsyncpa [#allocation6], 1 }
 0x24c   :  { %230 = vsyncpa [#allocation4], 1 }

</bundles_post_ra>
